<compile_context>
chip_gen: v5e
topology: v5e:2x2
jax: 0.10.0
libtpu: 0.0.40
codegen_flags: <defaults>
</compile_context>

<pallas_src>
import functools

import jax
import jax.numpy as jnp
from jax.experimental import pallas as pl
from jax.experimental.pallas import tpu as pltpu


_ROW_QUANTUM = 16  # row-tile granularity: valid for f32 (8-sublane) and packed bf16 (16)


def _round_up(x, m):
    return ((x + m - 1) // m) * m


def _smooth_ce_kernel(x_ref, t_ref, o_ref, *, smoothing, num_classes, num_rows, tile_n):
    """One row-tile of label-smoothed cross entropy; writes per-row losses."""
    i = pl.program_id(0)

    # Load in native dtype, widen in-vreg (halves HBM traffic for bf16 ingress).
    x = x_ref[...].astype(jnp.float32)                       # (tile_n, C)
    t = t_ref[...]                                           # (tile_n, 1) int32

    # Numerically-stable pieces of log_softmax along the lane (class) axis.
    m = jnp.max(x, axis=-1, keepdims=True)                   # (tile_n, 1)
    shifted = x - m                                          # (tile_n, C)
    sum_exp = jnp.sum(jnp.exp(shifted), axis=-1, keepdims=True)   # exp on EUP slot
    log_z = jnp.log(sum_exp)                                 # (tile_n, 1)

    off = jnp.float32(smoothing / (num_classes - 1.0)) if num_classes > 1 else jnp.float32(0.0)
    on = jnp.float32(1.0 - smoothing)

    # Since sum_c(w_c) == 1:
    #   loss_row = sum_c(-w_c * (shifted_c - log_z)) = log_z - sum_c(w_c * shifted_c)
    col = jax.lax.broadcasted_iota(jnp.int32, (tile_n, num_classes), 1)
    w = jnp.where(col == t, on, off)                         # (tile_n, C)
    per_row = log_z - jnp.sum(w * shifted, axis=-1, keepdims=True)   # (tile_n, 1)

    # Mask rows past the true N. The trailing block may be partial: stale VMEM
    # rows can hold garbage, but a select cannot propagate their NaN/Inf, and
    # the partial output block is clipped on writeback anyway.
    row = jax.lax.broadcasted_iota(jnp.int32, (tile_n, 1), 0) + i * tile_n
    o_ref[...] = jnp.where(row < num_rows, per_row, 0.0)


def _vmem_capacity_bytes():
    try:
        return int(pltpu.get_tpu_info().vmem_capacity_bytes)
    except Exception:
        return 64 << 20  # conservative default (v7x per-TC VMEM)


def _choose_tile_n(num_rows, num_classes, itemsize, vmem_limit):
    # Live VMEM per row:
    #   - double-buffered native-dtype logits block:                2 * C * itemsize
    #   - live f32 temporaries (x, shifted, exp, iota, w, w*shift): ~24 B/elem
    #   - (tile_n,1) int32 target + (tile_n,1) f32 output blocks lane-pad to 128
    #     lanes and are double-buffered:                            ~2 KiB / row
    per_row = num_classes * (2 * itemsize + 24) + 2048
    fit_rows = int(vmem_limit * 0.8) // max(per_row, 1)
    # Bytes target: ~4 MiB of logits per block amortizes the ~0.35 us/step grid
    # overhead; keep at least 256 rows so small-C shapes still get real blocks.
    target_rows = max(256, (4 << 20) // max(num_classes * itemsize, 1))
    tile = max(_ROW_QUANTUM, min(fit_rows, target_rows))
    tile = max(_ROW_QUANTUM, (tile // _ROW_QUANTUM) * _ROW_QUANTUM)
    return min(tile, _round_up(num_rows, _ROW_QUANTUM))


def smooth_cross_entropy_loss(logits, target, smoothing=0.1, tile_n=None):
    """logits: (..., C) float (any dtype); target: (...) int. Returns scalar f32 loss."""
    C = logits.shape[-1]
    x2 = logits.reshape(-1, C)                       # keep native dtype (bf16 stays bf16)
    t2 = target.reshape(-1, 1).astype(jnp.int32)
    N = x2.shape[0]

    vmem_cap = _vmem_capacity_bytes()
    vmem_limit = min((vmem_cap * 3) // 4, 100 << 20)

    itemsize = jnp.dtype(x2.dtype).itemsize
    if tile_n is None:
        tile_n = _choose_tile_n(N, C, itemsize, vmem_limit)
    else:
        tile_n = min(_round_up(max(int(tile_n), 1), _ROW_QUANTUM), _round_up(N, _ROW_QUANTUM))

    n_tiles = pl.cdiv(N, tile_n)   # no input padding: trailing block may be partial

    kernel = functools.partial(
        _smooth_ce_kernel,
        smoothing=float(smoothing),
        num_classes=C,
        num_rows=N,
        tile_n=tile_n,
    )

    per_row = pl.pallas_call(
        kernel,
        out_shape=jax.ShapeDtypeStruct((N, 1), jnp.float32),
        grid_spec=pltpu.PrefetchScalarGridSpec(
            num_scalar_prefetch=0,
            grid=(n_tiles,),
            in_specs=[
                pl.BlockSpec((tile_n, C), lambda i: (i, 0)),
                pl.BlockSpec((tile_n, 1), lambda i: (i, 0)),
            ],
            out_specs=pl.BlockSpec((tile_n, 1), lambda i: (i, 0)),
        ),
        compiler_params=pltpu.CompilerParams(
            dimension_semantics=("parallel",),   # tiles are independent -> megacore-friendly
            vmem_limit_bytes=int(vmem_limit),
        ),
    )(x2, t2)

    # Final mean in the wrapper (tiny XLA reduce; avoids any serial accumulator).
    return jnp.mean(per_row)


def _reference(logits, target, smoothing=0.1):
    # Pure-JAX reference mirroring the PyTorch forward.
    C = logits.shape[-1]
    log_prob = jax.nn.log_softmax(logits.astype(jnp.float32), axis=-1)
    weight = jnp.full(logits.shape, smoothing / (C - 1.0), jnp.float32)
    onehot = jax.nn.one_hot(target, C, dtype=jnp.float32)
    weight = weight * (1.0 - onehot) + onehot * (1.0 - smoothing)
    return jnp.mean(jnp.sum(-weight * log_prob, axis=-1))


if __name__ == "__main__":
    key = jax.random.PRNGKey(0)
    k1, k2, k3, k4 = jax.random.split(key, 4)

    # Test 1: f32 logits, batch=2, seq=8, classes=32  ->  flattened to (16, 32).
    B, S, C = 2, 8, 32
    logits = jax.random.normal(k1, (B, S, C), dtype=jnp.float32)
    target = jax.random.randint(k2, (B, S), 0, C, dtype=jnp.int32)

    loss = jax.block_until_ready(smooth_cross_entropy_loss(logits, target, smoothing=0.1))
    ref = jax.block_until_ready(_reference(logits, target, smoothing=0.1))
    assert jnp.allclose(loss, ref, atol=1e-5, rtol=1e-5), (loss, ref)

    # Test 2: bf16 ingress, ragged row count with NO padding (exercises the
    # multi-tile grid, the partial trailing block and the row mask).
    N2, C2 = 21, 40
    logits2 = jax.random.normal(k3, (N2, C2), dtype=jnp.bfloat16)
    target2 = jax.random.randint(k4, (N2,), 0, C2, dtype=jnp.int32)

    loss2 = jax.block_until_ready(
        smooth_cross_entropy_loss(logits2, target2, smoothing=0.1, tile_n=16))
    ref2 = jax.block_until_ready(_reference(logits2, target2, smoothing=0.1))
    assert jnp.allclose(loss2, ref2, atol=1e-5, rtol=1e-5), (loss2, ref2)

    print("KERNEL_OK")
</pallas_src>

<mosaic_0001>
module attributes {stable_mosaic.version = 11 : i64} {
  func.func @_smooth_ce_kernel(%arg0: i32, %arg1: memref<16x32xf32, #tpu.memory_space<vmem>>, %arg2: memref<16x1xi32, #tpu.memory_space<vmem>>, %arg3: memref<16x1xf32, #tpu.memory_space<vmem>>) attributes {dimension_semantics = [#tpu.dimension_semantics<parallel>], iteration_bounds = array<i64: 1>, scalar_prefetch = 0 : i64, scratch_operands = 0 : i64, tpu.core_type = #tpu.core_type<tc>, window_params = [{transform_indices = @transform_0, window_bounds = array<i64: 16, 32>}, {transform_indices = @transform_1, window_bounds = array<i64: 16, 1>}, {transform_indices = @transform_2, window_bounds = array<i64: 16, 1>}]} {
    %c0 = arith.constant 0 : index
    %c0_0 = arith.constant 0 : index
    %0 = vector.load %arg1[%c0, %c0_0] : memref<16x32xf32, #tpu.memory_space<vmem>>, vector<16x32xf32>
    %c0_1 = arith.constant 0 : index
    %c0_2 = arith.constant 0 : index
    %1 = vector.load %arg2[%c0_1, %c0_2] : memref<16x1xi32, #tpu.memory_space<vmem>>, vector<16x1xi32>
    %cst = arith.constant dense<0xFF800000> : vector<16xf32>
    %2 = vector.multi_reduction <maximumf>, %0, %cst [1] : vector<16x32xf32> to vector<16xf32>
    %3 = vector.shape_cast %2 : vector<16xf32> to vector<16x1xf32>
    %4 = vector.broadcast %3 : vector<16x1xf32> to vector<16x32xf32>
    %5 = arith.subf %0, %4 : vector<16x32xf32>
    %6 = math.exp %5 : vector<16x32xf32>
    %cst_3 = arith.constant dense<0.000000e+00> : vector<16xf32>
    %7 = vector.multi_reduction <add>, %6, %cst_3 [1] : vector<16x32xf32> to vector<16xf32>
    %8 = vector.shape_cast %7 : vector<16xf32> to vector<16x1xf32>
    %9 = math.log %8 : vector<16x1xf32>
    %10 = tpu.iota {dimensions = array<i32: 1>} : vector<16x32xi32>
    %11 = vector.broadcast %1 : vector<16x1xi32> to vector<16x32xi32>
    %12 = arith.cmpi eq, %10, %11 : vector<16x32xi32>
    %cst_4 = arith.constant 0.899999976 : f32
    %cst_5 = arith.constant 0.0032258064 : f32
    %13 = vector.broadcast %cst_4 : f32 to vector<16x32xf32>
    %14 = vector.broadcast %cst_5 : f32 to vector<16x32xf32>
    %15 = arith.select %12, %13, %14 : vector<16x32xi1>, vector<16x32xf32>
    %16 = arith.mulf %15, %5 : vector<16x32xf32>
    %cst_6 = arith.constant dense<0.000000e+00> : vector<16xf32>
    %17 = vector.multi_reduction <add>, %16, %cst_6 [1] : vector<16x32xf32> to vector<16xf32>
    %18 = vector.shape_cast %17 : vector<16xf32> to vector<16x1xf32>
    %19 = arith.subf %9, %18 : vector<16x1xf32>
    %20 = tpu.iota {dimensions = array<i32: 0>} : vector<16x1xi32>
    %c16_i32 = arith.constant 16 : i32
    %21 = arith.muli %arg0, %c16_i32 : i32
    %22 = vector.broadcast %21 : i32 to vector<16x1xi32>
    %23 = arith.addi %20, %22 : vector<16x1xi32>
    %c16_i32_7 = arith.constant 16 : i32
    %24 = vector.broadcast %c16_i32_7 : i32 to vector<16x1xi32>
    %25 = arith.cmpi slt, %23, %24 : vector<16x1xi32>
    %cst_8 = arith.constant 0.000000e+00 : f32
    %26 = vector.broadcast %cst_8 : f32 to vector<16x1xf32>
    %27 = arith.select %25, %19, %26 : vector<16x1xi1>, vector<16x1xf32>
    %c0_9 = arith.constant 0 : index
    %c0_10 = arith.constant 0 : index
    %28 = vector.load %arg3[%c0_9, %c0_10] : memref<16x1xf32, #tpu.memory_space<vmem>>, vector<16x1xf32>
    tpu.vector_store %arg3[%c0_9, %c0_10], %27 {strides = array<i32>} : memref<16x1xf32, #tpu.memory_space<vmem>>, vector<16x1xf32>,
    return
  }
  func.func @transform_0(%arg0: i32) -> (i32, i32) {
    %c0_i32 = arith.constant 0 : i32
    %c0_i32_0 = arith.constant 0 : i32
    return %arg0, %c0_i32 : i32, i32
  }
  func.func @transform_1(%arg0: i32) -> (i32, i32) {
    %c0_i32 = arith.constant 0 : i32
    %c0_i32_0 = arith.constant 0 : i32
    return %arg0, %c0_i32 : i32, i32
  }
  func.func @transform_2(%arg0: i32) -> (i32, i32) {
    %c0_i32 = arith.constant 0 : i32
    %c0_i32_0 = arith.constant 0 : i32
    return %arg0, %c0_i32 : i32, i32
  }
}

</mosaic_0001>

<bundles_post_ra>
// kernel: tpu_custom_call.1
= control target key start
LH: loop header
LB: loop body
LE: loop exit
PB: predicated region body
PF: predicated region fallthrough
CT: control target
= control target key end

     0   :  { %vm15_vm0 = vcmask 261120   ;;  %v90_v0 = vmov 0   ;;  %v38_v7 = vlaneseq  ;;  %v91_v10 = vmov 0.0032258064   ;;  %s131_s0 = inlined_call_operand.vmem [shape: f32[16,32], index: 0, kind: input, shape index: {}]   ;;  %s132_s1 = inlined_call_operand.vmem [shape: s32[16,1], index: 1, kind: input, shape index: {}]   ;;  %s133_s2 = inlined_call_operand.vmem [shape: f32[16,1], index: 2, kind: output, shape index: {}]  }
   0x1   :  { %80 = vset.pattern.permute.xlu1 %v90_v0  ;;  %v11_v1 = vld [vmem:[%s131_s0] sm:$0xff]  ;;  %81 = vset.pattern.permute.xlu0 %v90_v0  ;;  %v12_v4 = vld [vmem:[%s131_s0 + $0x8] sm:$0xff]  ;;  %vm71_vm3 = vcmask 7168  }
   0x2   :  { %v13_v2 = vld [vmem:[%s132_s1] sm:$0xff]  ;;  %v16_v3 = vsel %vm15_vm0, %v11_v1, -inf  ;;  %v14_v5 = vld [vmem:[%s132_s1 + $0x8] sm:$0xff]  ;;  %v19_v6 = vsel %vm15_vm0, %v12_v4, -inf  ;;  %v39_v8 = vand.u32 127, %v38_v7 }
   0x3   :  { %41 = vperm.xlu1 %80, %v13_v2   ;;  %17 = vmax.xlane.f32.xlu0 %v16_v3 }
   0xb   :  { %44 = vperm.xlu1 %80, %v14_v5   ;;  %20 = vmax.xlane.f32.xlu0 %v19_v6 }
  0x75   :  { %v42_v9 = vpop.permute.xlu1 %41 }
  0x76   :  { %vm46_vm1 = vcmp.eq.s32.totalorder %v39_v8, %v42_v9  ;;  %v18_v12 = vpop.xlane.xlu0 %17 }
  0x77   :  { %v48_v11 = vsel %vm46_vm1, 0.9, %v91_v10  ;;  %v22_v13 = vsub.f32 %v11_v1, %v18_v12 }
  0x79   :  { %v24_v14 = vmul.f32 1.442695, %v22_v13  ;;  %v50_v15 = vmul.f32 %v48_v11, %v22_v13 }
  0x7b   :  { %82 = vpow2.f32 %v24_v14  ;;  %v52_v16 = vsel %vm15_vm0, %v50_v15, 0.0 }
  0x7c   :  { %53 = vadd.xlane.f32.xlu0 %v52_v16 }
  0x7d   :  { %v45_v17 = vpop.permute.xlu1 %44 }
  0x7e   :  { %vm47_vm2 = vcmp.eq.s32.totalorder %v39_v8, %v45_v17  ;;  %v21_v19 = vpop.xlane.xlu0 %20 }
  0x7f   :  { %v49_v18 = vsel %vm47_vm2, 0.9, %v91_v10  ;;  %v23_v20 = vsub.f32 %v12_v4, %v21_v19 }
  0x81   :  { %v83_v21 = vpop.eup %82  ;;  %v26_v22 = vmul.f32 1.442695, %v23_v20  ;;  %v51_v23 = vmul.f32 %v49_v18, %v23_v20 }
  0x82   :  { %v28_v24 = vsel %vm15_vm0, %v83_v21, 0.0 }
  0x83   :  { %84 = vpow2.f32 %v26_v22  ;;  %29 = vadd.xlane.f32.xlu2 %v28_v24  ;;  %v55_v25 = vsel %vm15_vm0, %v51_v23, 0.0 }
  0x84   :  { %56 = vadd.xlane.f32.xlu1 %v55_v25 }
  0x89   :  { %v85_v26 = vpop.eup %84 }
  0x8a   :  { %v31_v27 = vsel %vm15_vm0, %v85_v26, 0.0 }
  0x8b   :  { %32 = vadd.xlane.f32.xlu2 %v31_v27 }
  0xef   :  { %v54_v32 = vpop.xlane.xlu0 %53 }
  0xf6   :  { %v30_v28 = vpop.xlane.xlu2 %29 }
  0xf7   :  { %86 = vlog2.f32 %v30_v28  ;;  %v57_v36 = vpop.xlane.xlu1 %56 }
  0xfd   :  { %v87_v29 = vpop.eup %86 }
  0xfe   :  { %v35_v30 = vmul.f32 0.6931472, %v87_v29  ;;  %v33_v31 = vpop.xlane.xlu2 %32 }
  0xff   :  { %88 = vlog2.f32 %v33_v31 }
 0x100   :  { %v58_v33 = vsub.f32 %v35_v30, %v54_v32 }
 0x102   :  { %72 = vst.msk [vmem:[%s133_s2] sm:$0xff] %vm71_vm3, %v58_v33 }
 0x105   :  { %v89_v34 = vpop.eup %88 }
 0x106   :  { %v37_v35 = vmul.f32 0.6931472, %v89_v34 }
 0x108   :  { %v59_v37 = vsub.f32 %v37_v35, %v57_v36 }
 0x10a   :  { %73 = vst.msk [vmem:[%s133_s2 + $0x8] sm:$0xff] %vm71_vm3, %v59_v37 }

</bundles_post_ra>
